<compile_context>
chip_gen: v5e
topology: v5e:2x2
jax: 0.10.0
libtpu: 0.0.40
codegen_flags: <defaults>
</compile_context>

<pallas_src>
import jax
import jax.numpy as jnp
from jax.experimental import pallas as pl
from jax.experimental.pallas import tpu as pltpu


def _round_up(x, m):
    return ((x + m - 1) // m) * m


# ---------------------------------------------------------------- kernels ---
def _conv_stats_kernel(a_ref, w_ref, y_ref, stats_ref, acc_ref):
    # grid = (m_tiles, n_tiles, k_tiles); K (reduction) is innermost.
    # Fused: (TM,TK)@(TK,TN) accumulation + per-channel sum / sum-of-squares
    # partials (one (2,TN) slab per (m,n) tile), written at the last K step.
    kk = pl.program_id(2)

    @pl.when(kk == 0)
    def _():
        acc_ref[...] = jnp.zeros_like(acc_ref)

    acc_ref[...] += jnp.dot(a_ref[...], w_ref[...],
                            preferred_element_type=jnp.float32)

    @pl.when(kk == pl.num_programs(2) - 1)
    def _():
        y = acc_ref[...]
        y_ref[...] = y
        # Padded M rows / padded Cout columns are exactly zero, so they
        # contribute nothing to the sums -- no masking needed.
        s = jnp.sum(y, axis=0, keepdims=True)        # (1, TN)
        sq = jnp.sum(y * y, axis=0, keepdims=True)   # (1, TN)
        stats_ref[0] = jnp.concatenate([s, sq], axis=0)   # (2, TN)


def _bn_relu6_kernel(y_ref, scale_ref, shift_ref, o_ref):
    o_ref[...] = jnp.clip(y_ref[...] * scale_ref[...] + shift_ref[...],
                          0.0, 6.0)  # relu6


# ---------------------------------------------------------------- wrapper ---
def conv_block_forward(x_nchw, conv_w, gamma, beta, *, stride=1, padding=0,
                       eps=1e-5):
    """F.relu6(BatchNorm2d(Conv2d(x, bias=False)))  (training-mode BN stats)."""
    N, Cin, H, W = x_nchw.shape
    Cout, Cin_w, kh, kw = conv_w.shape
    assert Cin == Cin_w and kh == kw, "square kernel, groups=1 only"
    k, s, p = int(kh), int(stride), int(padding)

    OH = (H + 2 * p - k) // s + 1
    OW = (W + 2 * p - k) // s + 1
    M = N * OH * OW
    K = k * k * Cin

    # --- im2col (glue, plain JAX) in bf16 to halve patch-matrix HBM traffic ---
    x = jnp.transpose(x_nchw, (0, 2, 3, 1)).astype(jnp.bfloat16)  # NHWC
    xp = jnp.pad(x, ((0, 0), (p, p), (p, p), (0, 0)))
    cols = []
    for ih in range(k):
        for iw in range(k):
            cols.append(xp[:, ih:ih + s * OH:s, iw:iw + s * OW:s, :])
    # patch element ordering: (kh, kw, cin) -> matches weight reshape below
    patches = jnp.stack(cols, axis=3).reshape(M, K)
    wmat = jnp.transpose(conv_w, (2, 3, 1, 0)).reshape(
        K, Cout).astype(jnp.bfloat16)

    # --- tile sizes: lane-dense (pad K/Cout to 128 multiples), large TM ---
    TM = 512
    Kp = _round_up(K, 128)
    TK = 512 if Kp % 512 == 0 else (256 if Kp % 256 == 0 else 128)
    Coutp = _round_up(Cout, 128)
    TN = 256 if Coutp % 256 == 0 else 128
    Mp = _round_up(M, TM)

    patches = jnp.pad(patches, ((0, Mp - M), (0, Kp - K)))
    wmat = jnp.pad(wmat, ((0, Kp - K), (0, Coutp - Cout)))

    m_t, n_t, k_t = Mp // TM, Coutp // TN, Kp // TK

    # VMEM budget: double-buffered A/W/y tiles + acc scratch, with 2x headroom,
    # clamped well below v7x's 64 MiB physical VMEM.
    vmem_bytes = (2 * (TM * TK * 2 + TK * TN * 2 + TM * TN * 4 + 2 * TN * 4)
                  + TM * TN * 4)
    vmem_limit = int(min(max(2 * vmem_bytes, 16 << 20), 40 << 20))

    # --- kernel 1: conv-as-matmul fused with BN sum / sum-of-squares ---
    y, stats = pl.pallas_call(
        _conv_stats_kernel,
        out_shape=(jax.ShapeDtypeStruct((Mp, Coutp), jnp.float32),
                   jax.ShapeDtypeStruct((m_t, 2, Coutp), jnp.float32)),
        grid_spec=pltpu.PrefetchScalarGridSpec(
            num_scalar_prefetch=0,
            grid=(m_t, n_t, k_t),
            in_specs=[pl.BlockSpec((TM, TK), lambda i, j, kk: (i, kk)),
                      pl.BlockSpec((TK, TN), lambda i, j, kk: (kk, j))],
            out_specs=[pl.BlockSpec((TM, TN), lambda i, j, kk: (i, j)),
                       pl.BlockSpec((1, 2, TN), lambda i, j, kk: (i, 0, j))],
            scratch_shapes=[pltpu.VMEM((TM, TN), jnp.float32)]),
        compiler_params=pltpu.CompilerParams(
            dimension_semantics=("parallel", "parallel", "arbitrary"),
            vmem_limit_bytes=vmem_limit),
    )(patches, wmat)

    # --- tiny scalar math on the (m_t, 2, Coutp) partial stats (plain JAX) ---
    ssum = jnp.sum(stats, axis=0)                  # (2, Coutp)
    mean = ssum[0] / M
    # biased variance (PyTorch BN normalization); clamp against cancellation
    var = jnp.maximum(ssum[1] / M - mean * mean, 0.0)
    inv_std = jax.lax.rsqrt(var + eps)
    g32 = jnp.pad(gamma.astype(jnp.float32), (0, Coutp - Cout))
    b32 = jnp.pad(beta.astype(jnp.float32), (0, Coutp - Cout))
    scale = (g32 * inv_std).reshape(1, Coutp)
    shift = (b32 - mean * g32 * inv_std).reshape(1, Coutp)

    # --- kernel 2: fused BN affine + relu6 (pure HBM-bound elementwise pass) ---
    out = pl.pallas_call(
        _bn_relu6_kernel,
        out_shape=jax.ShapeDtypeStruct((Mp, Coutp), jnp.float32),
        grid=(m_t, n_t),
        in_specs=[pl.BlockSpec((TM, TN), lambda i, j: (i, j)),
                  pl.BlockSpec((1, TN), lambda i, j: (0, j)),
                  pl.BlockSpec((1, TN), lambda i, j: (0, j))],
        out_specs=pl.BlockSpec((TM, TN), lambda i, j: (i, j)),
        compiler_params=pltpu.CompilerParams(
            dimension_semantics=("parallel", "parallel"),
            vmem_limit_bytes=vmem_limit),
    )(y, scale, shift)

    out = out[:M, :Cout].reshape(N, OH, OW, Cout)
    return jnp.transpose(out, (0, 3, 1, 2))  # back to NCHW


# -------------------------------------------------------------- reference ---
def conv_block_reference(x, w, gamma, beta, *, stride, padding, eps=1e-5):
    y = jax.lax.conv_general_dilated(
        x.astype(jnp.float32), w.astype(jnp.float32),
        window_strides=(stride, stride),
        padding=[(padding, padding), (padding, padding)],
        dimension_numbers=("NCHW", "OIHW", "NCHW"))
    mean = jnp.mean(y, axis=(0, 2, 3), keepdims=True)
    var = jnp.var(y, axis=(0, 2, 3), keepdims=True)
    yn = (y - mean) / jnp.sqrt(var + eps)
    yn = yn * gamma.reshape(1, -1, 1, 1) + beta.reshape(1, -1, 1, 1)
    return jnp.clip(yn, 0.0, 6.0)


# ------------------------------------------------------------------- main ---
if __name__ == "__main__":
    # ConvBlock(in_c=4, out_c=8, k=3, s=1, p=1) on a (2, 4, 16, 16) input
    N, Cin, H, W = 2, 4, 16, 16
    Cout, k, s, p = 8, 3, 1, 1

    key = jax.random.PRNGKey(0)
    kx, kw, kg, kb = jax.random.split(key, 4)
    x = jax.random.normal(kx, (N, Cin, H, W), dtype=jnp.float32)
    conv_w = jax.random.normal(kw, (Cout, Cin, k, k), dtype=jnp.float32) * 0.1
    gamma = 1.0 + 0.1 * jax.random.normal(kg, (Cout,), dtype=jnp.float32)
    beta = 0.1 * jax.random.normal(kb, (Cout,), dtype=jnp.float32)

    out = conv_block_forward(x, conv_w, gamma, beta, stride=s, padding=p)
    out = jax.block_until_ready(out)

    ref = conv_block_reference(x, conv_w, gamma, beta, stride=s, padding=p)
    assert out.shape == ref.shape == (N, Cout, H, W)
    # bf16 MXU operands (f32 accumulation) -> tolerance loosened vs pure-f32.
    assert jnp.allclose(out, ref, atol=2e-2, rtol=2e-2), (
        float(jnp.max(jnp.abs(out - ref))))

    print("KERNEL_OK")
</pallas_src>

<mosaic_0001>
module attributes {stable_mosaic.version = 11 : i64} {
  func.func @_conv_stats_kernel(%arg0: i32, %arg1: i32, %arg2: i32, %arg3: memref<512x128xbf16, #tpu.memory_space<vmem>>, %arg4: memref<128x128xbf16, #tpu.memory_space<vmem>>, %arg5: memref<512x128xf32, #tpu.memory_space<vmem>>, %arg6: memref<1x2x128xf32, #tpu.memory_space<vmem>>, %arg7: memref<512x128xf32, #tpu.memory_space<vmem>>) attributes {dimension_semantics = [#tpu.dimension_semantics<parallel>, #tpu.dimension_semantics<parallel>, #tpu.dimension_semantics<arbitrary>], iteration_bounds = array<i64: 1, 1, 1>, scalar_prefetch = 0 : i64, scratch_operands = 1 : i64, tpu.core_type = #tpu.core_type<tc>, window_params = [{transform_indices = @transform_0, window_bounds = array<i64: 512, 128>}, {transform_indices = @transform_1, window_bounds = array<i64: 128, 128>}, {transform_indices = @transform_2, window_bounds = array<i64: 512, 128>}, {transform_indices = @transform_3, window_bounds = array<i64: 1, 2, 128>}]} {
    %c0_i32 = arith.constant 0 : i32
    %0 = arith.cmpi eq, %arg2, %c0_i32 : i32
    %1 = arith.extui %0 : i1 to i32
    %c0_i32_0 = arith.constant 0 : i32
    %2 = arith.cmpi ne, %1, %c0_i32_0 : i32
    scf.if %2 {
      %cst_10 = arith.constant 0.000000e+00 : f32
      %12 = vector.broadcast %cst_10 : f32 to vector<512x128xf32>
      %c0_11 = arith.constant 0 : index
      %c0_12 = arith.constant 0 : index
      %13 = vector.load %arg7[%c0_11, %c0_12] : memref<512x128xf32, #tpu.memory_space<vmem>>, vector<512x128xf32>
      tpu.vector_store %arg7[%c0_11, %c0_12], %12 {strides = array<i32>} : memref<512x128xf32, #tpu.memory_space<vmem>>, vector<512x128xf32>,
    } else {
    }
    %c0 = arith.constant 0 : index
    %c0_1 = arith.constant 0 : index
    %3 = vector.load %arg7[%c0, %c0_1] : memref<512x128xf32, #tpu.memory_space<vmem>>, vector<512x128xf32>
    %c0_2 = arith.constant 0 : index
    %c0_3 = arith.constant 0 : index
    %4 = vector.load %arg3[%c0_2, %c0_3] : memref<512x128xbf16, #tpu.memory_space<vmem>>, vector<512x128xbf16>
    %c0_4 = arith.constant 0 : index
    %c0_5 = arith.constant 0 : index
    %5 = vector.load %arg4[%c0_4, %c0_5] : memref<128x128xbf16, #tpu.memory_space<vmem>>, vector<128x128xbf16>
    %cst = arith.constant dense<0.000000e+00> : vector<512x128xf32>
    %6 = tpu.matmul %4, %5, %cst {dimension_numbers = #tpu.dot_dimension_numbers<[1], [0], [0], [1], [0, 0, 1, 1], [], []>} : vector<512x128xbf16>, vector<128x128xbf16>, vector<512x128xf32> -> vector<512x128xf32>
    %7 = arith.addf %3, %6 : vector<512x128xf32>
    %c0_6 = arith.constant 0 : index
    %c0_7 = arith.constant 0 : index
    %8 = vector.load %arg7[%c0_6, %c0_7] : memref<512x128xf32, #tpu.memory_space<vmem>>, vector<512x128xf32>
    tpu.vector_store %arg7[%c0_6, %c0_7], %7 {strides = array<i32>} : memref<512x128xf32, #tpu.memory_space<vmem>>, vector<512x128xf32>,
    %c0_i32_8 = arith.constant 0 : i32
    %9 = arith.cmpi eq, %arg2, %c0_i32_8 : i32
    %10 = arith.extui %9 : i1 to i32
    %c0_i32_9 = arith.constant 0 : i32
    %11 = arith.cmpi ne, %10, %c0_i32_9 : i32
    scf.if %11 {
      %c0_10 = arith.constant 0 : index
      %c0_11 = arith.constant 0 : index
      %12 = vector.load %arg7[%c0_10, %c0_11] : memref<512x128xf32, #tpu.memory_space<vmem>>, vector<512x128xf32>
      %c0_12 = arith.constant 0 : index
      %c0_13 = arith.constant 0 : index
      %13 = vector.load %arg5[%c0_12, %c0_13] : memref<512x128xf32, #tpu.memory_space<vmem>>, vector<512x128xf32>
      tpu.vector_store %arg5[%c0_12, %c0_13], %12 {strides = array<i32>} : memref<512x128xf32, #tpu.memory_space<vmem>>, vector<512x128xf32>,
      %cst_14 = arith.constant dense<0.000000e+00> : vector<128xf32>
      %14 = vector.multi_reduction <add>, %12, %cst_14 [0] : vector<512x128xf32> to vector<128xf32>
      %15 = vector.shape_cast %14 : vector<128xf32> to vector<1x128xf32>
      %16 = arith.mulf %12, %12 : vector<512x128xf32>
      %cst_15 = arith.constant dense<0.000000e+00> : vector<128xf32>
      %17 = vector.multi_reduction <add>, %16, %cst_15 [0] : vector<512x128xf32> to vector<128xf32>
      %18 = vector.shape_cast %17 : vector<128xf32> to vector<1x128xf32>
      %19 = tpu.concatenate %15, %18 in 0 : vector<1x128xf32>, vector<1x128xf32> -> vector<2x128xf32>
      %c0_16 = arith.constant 0 : index
      %c0_17 = arith.constant 0 : index
      %c0_18 = arith.constant 0 : index
      %20 = vector.load %arg6[%c0_16, %c0_17, %c0_18] : memref<1x2x128xf32, #tpu.memory_space<vmem>>, vector<1x2x128xf32>
      %21 = vector.shape_cast %20 : vector<1x2x128xf32> to vector<2x128xf32>
      %22 = vector.shape_cast %19 : vector<2x128xf32> to vector<1x2x128xf32>
      tpu.vector_store %arg6[%c0_16, %c0_17, %c0_18], %22 {strides = array<i32>} : memref<1x2x128xf32, #tpu.memory_space<vmem>>, vector<1x2x128xf32>,
    } else {
    }
    return
  }
  func.func @transform_0(%arg0: i32, %arg1: i32, %arg2: i32) -> (i32, i32) {
    %c0_i32 = arith.constant 0 : i32
    return %arg0, %arg2 : i32, i32
  }
  func.func @transform_1(%arg0: i32, %arg1: i32, %arg2: i32) -> (i32, i32) {
    %c0_i32 = arith.constant 0 : i32
    return %arg2, %arg1 : i32, i32
  }
  func.func @transform_2(%arg0: i32, %arg1: i32, %arg2: i32) -> (i32, i32) {
    %c0_i32 = arith.constant 0 : i32
    return %arg0, %arg1 : i32, i32
  }
  func.func @transform_3(%arg0: i32, %arg1: i32, %arg2: i32) -> (i32, i32, i32) {
    %c0_i32 = arith.constant 0 : i32
    %c0_i32_0 = arith.constant 0 : i32
    return %arg0, %c0_i32, %arg1 : i32, i32, i32
  }
}

</mosaic_0001>

<bundles_post_ra>
// kernel: tpu_custom_call.1
= control target key start
LH: loop header
LB: loop body
LE: loop exit
PB: predicated region body
PF: predicated region fallthrough
CT: control target
= control target key end

     0   :  { %9 = vsyncpa [#allocation4], 0  ;;  %s1838_s0 = inlined_call_operand.hbm [shape: bf16[512,128], index: 0, kind: input, shape index: {}]   ;;  %s1839_s1 = inlined_call_operand.hbm [shape: bf16[128,128], index: 1, kind: input, shape index: {}]   ;;  %s1840_s2 = inlined_call_operand.hbm [shape: f32[512,128], index: 2, kind: output, shape index: {0}]   ;;  %s1841_s3 = inlined_call_operand.hbm [shape: f32[1,2,128], index: 3, kind: output, shape index: {1}]  }
   0x1   :  { %10 = vsyncpa [#allocation7], 0 }
   0x2   :  { %11 = vsyncpa [#allocation5], 0 }
   0x3   :  { %12 = vsyncpa [#allocation10], 0  ;;  %s17_s14 = sshll.u32 %s1838_s0, 4  ;;  %s1504_s15 = smov [#allocation3]   ;;  %s18_s14 = int_to_ptr.hbm [resolvable:$true] %s17_s14 }
   0x4   :  { %s19_s16 = sshll.u32 %s1504_s15, 4  ;;  %s30_s19 = sshll.u32 %s1839_s1, 4  ;;  %s20_s16 = int_to_ptr.vmem [resolvable:$true] %s19_s16  ;;  %s31_s19 = int_to_ptr.hbm [resolvable:$true] %s30_s19 }
   0x5   :  { %s1505_s20 = smov 64   ;;  %s1506_s21 = smov 4  }
   0x6   :  { %25 = dma.hbm_to_vmem [thread:$0]  %s18_s14, 4096, %s20_s16, [#allocation4], %s1505_s20, %s1505_s20, %s1506_s21  }
   0x7   :  { %s1507_s22 = smov [#allocation6]  }
   0x8   :  { %s32_s23 = sshll.u32 %s1507_s22, 4  ;;  %s33_s23 = int_to_ptr.vmem [resolvable:$true] %s32_s23 }
   0x9   :  { %38 = dma.hbm_to_vmem [thread:$0]  %s31_s19, 1024, %s33_s23, [#allocation7], %s1505_s20, %s1505_s20, %s1506_s21  }
   0xa   :  { %1496 = dma.done.wait [#allocation4], 4096  }
   0xb   :  { %1497 = vsyncadd [#allocation4], 4294963200 }
   0xc   :  { %1498 = dma.done.wait [#allocation7], 1024  }
   0xd   :  { %1499 = vsyncadd [#allocation7], 4294966272  ;;  %v1367_v0 = vld [vmem:[#allocation6 + $0x38] sm:$0xff]  ;;  %v1366_v1 = vld [vmem:[#allocation6 + $0x30] sm:$0xff]  ;;  %s1508_s0 = smov [#allocation8]   ;;  %s1138_s26 = sshll.u32 %s1840_s2, 4  ;;  %s1139_s26 = int_to_ptr.hbm [resolvable:$true] %s1138_s26 }
   0xe   :  { %499 = vmatpush.bf16.msra.mxu0 %v1367_v0  ;;  %1368 = vmatpush.bf16.msra.mxu1 %v1367_v0  ;;  %v1365_v2 = vld [vmem:[#allocation6 + $0x28] sm:$0xff]  ;;  %v1364_v3 = vld [vmem:[#allocation6 + $0x20] sm:$0xff]  ;;  %v1363_v4 = vld [vmem:[#allocation6 + $0x18] sm:$0xff]  ;;  %s1136_s1 = sshll.u32 %s1508_s0, 4  ;;  %s1509_s2 = smov 128   ;;  %vm1129_vm0 = vcmask 1040384   ;;  %s1137_s1 = int_to_ptr.vmem [resolvable:$true] %s1136_s1 }
   0xf   :  { %1369 = vmatpush.bf16.msra.mxu2 %v1367_v0  ;;  %1370 = vmatpush.bf16.msra.mxu3 %v1367_v0  ;;  %v1362_v5 = vld [vmem:[#allocation6 + $0x10] sm:$0xff]  ;;  %v1361_v6 = vld [vmem:[#allocation6 + $0x8] sm:$0xff]  ;;  %v1360_v7 = vld [vmem:[#allocation6] sm:$0xff]  ;;  %s1510_s27 = smov 8   ;;  %s1511_s28 = smov [#allocation9]  }
  0x10   :  { %v1328_v8 = vld [vmem:[#allocation3] sm:$0xff]  ;;  %v1329_v10 = vld [vmem:[#allocation3 + $0x8] sm:$0xff]  ;;  %v1330_v13 = vld [vmem:[#allocation3 + $0x10] sm:$0xff]  ;;  %s1150_s29 = sshll.u32 %s1511_s28, 4  ;;  %s1152_s5 = sshll.u32 %s1841_s3, 4  ;;  %s1151_s29 = int_to_ptr.vmem [resolvable:$true] %s1150_s29  ;;  %s1153_s5 = int_to_ptr.hbm [resolvable:$true] %s1152_s5 }
  0x11   :  { %v1336_v9 = vld [vmem:[#allocation3 + $0x40] sm:$0xff]  ;;  %v1337_v11 = vld [vmem:[#allocation3 + $0x48] sm:$0xff]  ;;  %v1338_v14 = vld [vmem:[#allocation3 + $0x50] sm:$0xff] }
  0x12   :  { %500 = vmatpush.bf16.msra.mxu0 %v1366_v1  ;;  %1371 = vmatpush.bf16.msra.mxu1 %v1366_v1  ;;  %v1344_v12 = vld [vmem:[#allocation3 + $0x80] sm:$0xff]  ;;  %v1345_v15 = vld [vmem:[#allocation3 + $0x88] sm:$0xff]  ;;  %v1331_v16 = vld [vmem:[#allocation3 + $0x18] sm:$0xff] }
  0x13   :  { %1372 = vmatpush.bf16.msra.mxu2 %v1366_v1  ;;  %1373 = vmatpush.bf16.msra.mxu3 %v1366_v1  ;;  %v1339_v17 = vld [vmem:[#allocation3 + $0x58] sm:$0xff]  ;;  %v1346_v18 = vld [vmem:[#allocation3 + $0x90] sm:$0xff]  ;;  %v1352_v19 = vld [vmem:[#allocation3 + $0xc0] sm:$0xff] }
  0x14   :  { %v1332_v20 = vld [vmem:[#allocation3 + $0x20] sm:$0xff]  ;;  %v1347_v22 = vld [vmem:[#allocation3 + $0x98] sm:$0xff]  ;;  %v1353_v23 = vld [vmem:[#allocation3 + $0xc8] sm:$0xff] }
  0x15   :  { %v1340_v21 = vld [vmem:[#allocation3 + $0x60] sm:$0xff]  ;;  %v1333_v24 = vld [vmem:[#allocation3 + $0x28] sm:$0xff]  ;;  %v1354_v27 = vld [vmem:[#allocation3 + $0xd0] sm:$0xff] }
  0x16   :  { %501 = vmatpush.bf16.msra.mxu0 %v1365_v2  ;;  %1374 = vmatpush.bf16.msra.mxu1 %v1365_v2  ;;  %v1341_v25 = vld [vmem:[#allocation3 + $0x68] sm:$0xff]  ;;  %v1348_v26 = vld [vmem:[#allocation3 + $0xa0] sm:$0xff]  ;;  %v1334_v28 = vld [vmem:[#allocation3 + $0x30] sm:$0xff] }
  0x17   :  { %1375 = vmatpush.bf16.msra.mxu2 %v1365_v2  ;;  %1376 = vmatpush.bf16.msra.mxu3 %v1365_v2  ;;  %v1342_v29 = vld [vmem:[#allocation3 + $0x70] sm:$0xff]  ;;  %v1349_v30 = vld [vmem:[#allocation3 + $0xa8] sm:$0xff]  ;;  %v1355_v31 = vld [vmem:[#allocation3 + $0xd8] sm:$0xff] }
  0x18   :  { %v1335_v32 = vld [vmem:[#allocation3 + $0x38] sm:$0xff]  ;;  %v1350_v34 = vld [vmem:[#allocation3 + $0xb0] sm:$0xff]  ;;  %v1356_v35 = vld [vmem:[#allocation3 + $0xe0] sm:$0xff] }
  0x19   :  { %v1343_v33 = vld [vmem:[#allocation3 + $0x78] sm:$0xff]  ;;  %v1357_v39 = vld [vmem:[#allocation3 + $0xe8] sm:$0xff]  ;;  %v1358_v51 = vld [vmem:[#allocation3 + $0xf0] sm:$0xff] }
  0x1a   :  { %502 = vmatpush.bf16.msra.mxu0 %v1364_v3  ;;  %1377 = vmatpush.bf16.msra.mxu1 %v1364_v3  ;;  %v1351_v38 = vld [vmem:[#allocation3 + $0xb8] sm:$0xff] }
  0x1b   :  { %1378 = vmatpush.bf16.msra.mxu2 %v1364_v3  ;;  %1379 = vmatpush.bf16.msra.mxu3 %v1364_v3  ;;  %v1359_v0 = vld [vmem:[#allocation3 + $0xf8] sm:$0xff] }
  0x1e   :  { %503 = vmatpush.bf16.msra.mxu0 %v1363_v4  ;;  %1380 = vmatpush.bf16.msra.mxu1 %v1363_v4 }
  0x1f   :  { %1381 = vmatpush.bf16.msra.mxu2 %v1363_v4  ;;  %1382 = vmatpush.bf16.msra.mxu3 %v1363_v4 }
  0x22   :  { %504 = vmatpush.bf16.msra.mxu0 %v1362_v5  ;;  %1383 = vmatpush.bf16.msra.mxu1 %v1362_v5 }
  0x23   :  { %1384 = vmatpush.bf16.msra.mxu2 %v1362_v5  ;;  %1385 = vmatpush.bf16.msra.mxu3 %v1362_v5 }
  0x26   :  { %505 = vmatpush.bf16.msra.mxu0 %v1361_v6  ;;  %1386 = vmatpush.bf16.msra.mxu1 %v1361_v6 }
  0x27   :  { %1387 = vmatpush.bf16.msra.mxu2 %v1361_v6  ;;  %1388 = vmatpush.bf16.msra.mxu3 %v1361_v6 }
  0x2a   :  { %506 = vmatpush.bf16.msra.mxu0 %v1360_v7  ;;  %1389 = vmatpush.bf16.msra.mxu1 %v1360_v7 }
  0x2b   :  { %1390 = vmatpush.bf16.msra.mxu2 %v1360_v7  ;;  %1391 = vmatpush.bf16.msra.mxu3 %v1360_v7 }
  0x2d   :  { %507 = vmatmul.bf16.vlgmr.msra.gmra.mxu0 %v1328_v8  ;;  %547 = vmatmul.bf16.vlgmr.msra.gmra.mxu1 %v1336_v9 }
  0x2e   :  { %587 = vmatmul.bf16.vlgmr.msra.gmra.mxu2 %v1344_v12  ;;  %627 = vmatmul.bf16.vlgmr.msra.gmra.mxu3 %v1352_v19 }
  0x3d   :  { %512 = vmatmul.bf16.gmra.mxu0 %v1329_v10  ;;  %552 = vmatmul.bf16.gmra.mxu1 %v1337_v11 }
  0x3e   :  { %592 = vmatmul.bf16.gmra.mxu2 %v1345_v15  ;;  %632 = vmatmul.bf16.gmra.mxu3 %v1353_v23 }
  0x4d   :  { %517 = vmatmul.bf16.gmra.mxu0 %v1330_v13  ;;  %557 = vmatmul.bf16.gmra.mxu1 %v1338_v14 }
  0x4e   :  { %597 = vmatmul.bf16.gmra.mxu2 %v1346_v18  ;;  %637 = vmatmul.bf16.gmra.mxu3 %v1354_v27 }
  0x5d   :  { %522 = vmatmul.bf16.gmra.mxu0 %v1331_v16  ;;  %562 = vmatmul.bf16.gmra.mxu1 %v1339_v17 }
  0x5e   :  { %602 = vmatmul.bf16.gmra.mxu2 %v1347_v22  ;;  %642 = vmatmul.bf16.gmra.mxu3 %v1355_v31 }
  0x6d   :  { %527 = vmatmul.bf16.gmra.mxu0 %v1332_v20  ;;  %567 = vmatmul.bf16.gmra.mxu1 %v1340_v21 }
  0x6e   :  { %607 = vmatmul.bf16.gmra.mxu2 %v1348_v26  ;;  %647 = vmatmul.bf16.gmra.mxu3 %v1356_v35 }
  0x7d   :  { %532 = vmatmul.bf16.gmra.mxu0 %v1333_v24  ;;  %572 = vmatmul.bf16.gmra.mxu1 %v1341_v25 }
  0x7e   :  { %612 = vmatmul.bf16.gmra.mxu2 %v1349_v30  ;;  %652 = vmatmul.bf16.gmra.mxu3 %v1357_v39 }
  0x8d   :  { %537 = vmatmul.bf16.gmra.mxu0 %v1334_v28  ;;  %577 = vmatmul.bf16.gmra.mxu1 %v1342_v29 }
  0x8e   :  { %617 = vmatmul.bf16.gmra.mxu2 %v1350_v34  ;;  %657 = vmatmul.bf16.gmra.mxu3 %v1358_v51 }
  0x9d   :  { %542 = vmatmul.bf16.gmra.mxu0 %v1335_v32  ;;  %582 = vmatmul.bf16.gmra.mxu1 %v1343_v33 }
  0x9e   :  { %622 = vmatmul.bf16.gmra.mxu2 %v1351_v38  ;;  %662 = vmatmul.bf16.gmra.mxu3 %v1359_v0 }
  0xaa   :  { %v508_v36 = vpop.f32.mrf.mxu0  ;;  %v1538_v37 = vpop.f32.mrf.mxu1 }
  0xab   :  { %863 = vst [vmem:[#allocation8] sm:$0xff] %v508_v36  ;;  %v996_v42 = vmul.f32 %v508_v36, %v508_v36 }
  0xac   :  { %879 = vst [vmem:[#allocation8 + $0x80] sm:$0xff] %v1538_v37 }
  0xb1   :  { %v1549_v56 = vpop.f32.mrf.mxu2  ;;  %v1579_v10 = vpop.f32.mrf.mxu3 }
  0xb2   :  { %v510_v40 = vpop.f32.mrf.mxu0  ;;  %v1541_v41 = vpop.f32.mrf.mxu1  ;;  %895 = vst [vmem:[#allocation8 + $0x100] sm:$0xff] %v1549_v56 }
  0xb3   :  { %864 = vst [vmem:[#allocation8 + $0x8] sm:$0xff] %v510_v40  ;;  %v927_v43 = vadd.f32 %v510_v40, %v508_v36  ;;  %v997_v44 = vmul.f32 %v510_v40, %v510_v40 }
  0xb4   :  { %880 = vst [vmem:[#allocation8 + $0x88] sm:$0xff] %v1541_v41 }
  0xb5   :  { %v1060_v45 = vadd.f32 %v997_v44, %v996_v42  ;;  %911 = vst [vmem:[#allocation8 + $0x180] sm:$0xff] %v1579_v10 }
  0xb9   :  { %v1557_v62 = vpop.f32.mrf.mxu2  ;;  %v1588_v14 = vpop.f32.mrf.mxu3 }
  0xba   :  { %v513_v46 = vpop.f32.mrf.mxu0  ;;  %v1544_v47 = vpop.f32.mrf.mxu1  ;;  %896 = vst [vmem:[#allocation8 + $0x108] sm:$0xff] %v1557_v62 }
  0xbb   :  { %865 = vst [vmem:[#allocation8 + $0x10] sm:$0xff] %v513_v46  ;;  %v928_v48 = vadd.f32 %v927_v43, %v513_v46  ;;  %v998_v49 = vmul.f32 %v513_v46, %v513_v46 }
  0xbc   :  { %881 = vst [vmem:[#allocation8 + $0x90] sm:$0xff] %v1544_v47 }
  0xbd   :  { %v1061_v50 = vadd.f32 %v1060_v45, %v998_v49  ;;  %912 = vst [vmem:[#allocation8 + $0x188] sm:$0xff] %v1588_v14 }
  0xc1   :  { %v1565_v3 = vpop.f32.mrf.mxu2  ;;  %v1597_v18 = vpop.f32.mrf.mxu3 }
  0xc2   :  { %v515_v52 = vpop.f32.mrf.mxu0  ;;  %v1547_v53 = vpop.f32.mrf.mxu1  ;;  %897 = vst [vmem:[#allocation8 + $0x110] sm:$0xff] %v1565_v3 }
  0xc3   :  { %866 = vst [vmem:[#allocation8 + $0x18] sm:$0xff] %v515_v52  ;;  %v929_v54 = vadd.f32 %v928_v48, %v515_v52  ;;  %v999_v55 = vmul.f32 %v515_v52, %v515_v52 }
  0xc4   :  { %882 = vst [vmem:[#allocation8 + $0x98] sm:$0xff] %v1547_v53 }
  0xc5   :  { %v1062_v57 = vadd.f32 %v1061_v50, %v999_v55  ;;  %913 = vst [vmem:[#allocation8 + $0x190] sm:$0xff] %v1597_v18 }
  0xc9   :  { %v1571_v6 = vpop.f32.mrf.mxu2  ;;  %v1606_v22 = vpop.f32.mrf.mxu3 }
  0xca   :  { %v518_v58 = vpop.f32.mrf.mxu0  ;;  %v1553_v59 = vpop.f32.mrf.mxu1  ;;  %898 = vst [vmem:[#allocation8 + $0x118] sm:$0xff] %v1571_v6 }
  0xcb   :  { %867 = vst [vmem:[#allocation8 + $0x20] sm:$0xff] %v518_v58  ;;  %v1555_v60 = vadd.f32 %v929_v54, %v518_v58  ;;  %v1000_v61 = vmul.f32 %v518_v58, %v518_v58 }
  0xcc   :  { %883 = vst [vmem:[#allocation8 + $0xa0] sm:$0xff] %v1553_v59 }
  0xcd   :  { %v1560_v63 = vadd.f32 %v1062_v57, %v1000_v61  ;;  %914 = vst [vmem:[#allocation8 + $0x198] sm:$0xff] %v1606_v22 }
  0xd1   :  { %v1577_v9 = vpop.f32.mrf.mxu2  ;;  %v1615_v26 = vpop.f32.mrf.mxu3 }
  0xd2   :  { %v520_v1 = vpop.f32.mrf.mxu0  ;;  %v1563_v2 = vpop.f32.mrf.mxu1  ;;  %899 = vst [vmem:[#allocation8 + $0x120] sm:$0xff] %v1577_v9 }
  0xd3   :  { %868 = vst [vmem:[#allocation8 + $0x28] sm:$0xff] %v520_v1  ;;  %v1001_v31 = vmul.f32 %v520_v1, %v520_v1  ;;  %v931_v32 = vadd.f32 %v1555_v60, %v520_v1 }
  0xd4   :  { %884 = vst [vmem:[#allocation8 + $0xa8] sm:$0xff] %v1563_v2 }
  0xd5   :  { %915 = vst [vmem:[#allocation8 + $0x1a0] sm:$0xff] %v1615_v26  ;;  %v1064_v34 = vadd.f32 %v1560_v63, %v1001_v31 }
  0xd9   :  { %v1586_v13 = vpop.f32.mrf.mxu2  ;;  %v1624_v30 = vpop.f32.mrf.mxu3 }
  0xda   :  { %v523_v4 = vpop.f32.mrf.mxu0  ;;  %v1569_v5 = vpop.f32.mrf.mxu1  ;;  %900 = vst [vmem:[#allocation8 + $0x128] sm:$0xff] %v1586_v13 }
  0xdb   :  { %869 = vst [vmem:[#allocation8 + $0x30] sm:$0xff] %v523_v4  ;;  %v1002_v33 = vmul.f32 %v523_v4, %v523_v4  ;;  %v932_v35 = vadd.f32 %v931_v32, %v523_v4 }
  0xdc   :  { %885 = vst [vmem:[#allocation8 + $0xb0] sm:$0xff] %v1569_v5 }
  0xdd   :  { %916 = vst [vmem:[#allocation8 + $0x1a8] sm:$0xff] %v1624_v30  ;;  %v1065_v40 = vadd.f32 %v1064_v34, %v1002_v33 }
  0xe1   :  { %v1595_v17 = vpop.f32.mrf.mxu2  ;;  %v1635_v45 = vpop.f32.mrf.mxu3 }
  0xe2   :  { %v525_v7 = vpop.f32.mrf.mxu0  ;;  %v1575_v8 = vpop.f32.mrf.mxu1  ;;  %901 = vst [vmem:[#allocation8 + $0x130] sm:$0xff] %v1595_v17 }
  0xe3   :  { %870 = vst [vmem:[#allocation8 + $0x38] sm:$0xff] %v525_v7  ;;  %v1003_v36 = vmul.f32 %v525_v7, %v525_v7  ;;  %v933_v42 = vadd.f32 %v932_v35, %v525_v7 }
  0xe4   :  { %886 = vst [vmem:[#allocation8 + $0xb8] sm:$0xff] %v1575_v8 }
  0xe5   :  { %v1066_v46 = vadd.f32 %v1065_v40, %v1003_v36  ;;  %917 = vst [vmem:[#allocation8 + $0x1b0] sm:$0xff] %v1635_v45 }
  0xe9   :  { %v1604_v21 = vpop.f32.mrf.mxu2  ;;  %v1644_v4 = vpop.f32.mrf.mxu3 }
  0xea   :  { %v528_v11 = vpop.f32.mrf.mxu0  ;;  %v1584_v12 = vpop.f32.mrf.mxu1  ;;  %902 = vst [vmem:[#allocation8 + $0x138] sm:$0xff] %v1604_v21 }
  0xeb   :  { %871 = vst [vmem:[#allocation8 + $0x40] sm:$0xff] %v528_v11  ;;  %v1004_v43 = vmul.f32 %v528_v11, %v528_v11  ;;  %v934_v48 = vadd.f32 %v933_v42, %v528_v11 }
  0xec   :  { %887 = vst [vmem:[#allocation8 + $0xc0] sm:$0xff] %v1584_v12 }
  0xed   :  { %v1067_v50 = vadd.f32 %v1066_v46, %v1004_v43  ;;  %918 = vst [vmem:[#allocation8 + $0x1b8] sm:$0xff] %v1644_v4  ;;  %v1012_v46 = vmul.f32 %v1538_v37, %v1538_v37 }
  0xf1   :  { %v1613_v25 = vpop.f32.mrf.mxu2 }
  0xf2   :  { %v530_v15 = vpop.f32.mrf.mxu0  ;;  %v1593_v16 = vpop.f32.mrf.mxu1  ;;  %903 = vst [vmem:[#allocation8 + $0x140] sm:$0xff] %v1613_v25 }
  0xf3   :  { %872 = vst [vmem:[#allocation8 + $0x48] sm:$0xff] %v530_v15  ;;  %v1005_v49 = vmul.f32 %v530_v15, %v530_v15  ;;  %v935_v51 = vadd.f32 %v934_v48, %v530_v15 }
  0xf4   :  { %888 = vst [vmem:[#allocation8 + $0xc8] sm:$0xff] %v1593_v16 }
  0xf5   :  { %v1068_v54 = vadd.f32 %v1067_v50, %v1005_v49  ;;  %v1013_v49 = vmul.f32 %v1541_v41, %v1541_v41 }
  0xf9   :  { %v1622_v29 = vpop.f32.mrf.mxu2 }
  0xfa   :  { %v533_v19 = vpop.f32.mrf.mxu0  ;;  %v1602_v20 = vpop.f32.mrf.mxu1  ;;  %904 = vst [vmem:[#allocation8 + $0x148] sm:$0xff] %v1622_v29 }
  0xfb   :  { %873 = vst [vmem:[#allocation8 + $0x50] sm:$0xff] %v533_v19  ;;  %v1006_v52 = vmul.f32 %v533_v19, %v533_v19  ;;  %v936_v55 = vadd.f32 %v935_v51, %v533_v19 }
  0xfc   :  { %889 = vst [vmem:[#allocation8 + $0xd0] sm:$0xff] %v1602_v20 }
  0xfd   :  { %v1069_v61 = vadd.f32 %v1068_v54, %v1006_v52  ;;  %v1014_v52 = vmul.f32 %v1544_v47, %v1544_v47 }
 0x101   :  { %v1633_v44 = vpop.f32.mrf.mxu2 }
 0x102   :  { %v535_v23 = vpop.f32.mrf.mxu0  ;;  %v1611_v24 = vpop.f32.mrf.mxu1  ;;  %905 = vst [vmem:[#allocation8 + $0x150] sm:$0xff] %v1633_v44 }
 0x103   :  { %874 = vst [vmem:[#allocation8 + $0x58] sm:$0xff] %v535_v23  ;;  %v1007_v57 = vmul.f32 %v535_v23, %v535_v23  ;;  %v937_v63 = vadd.f32 %v936_v55, %v535_v23 }
 0x104   :  { %890 = vst [vmem:[#allocation8 + $0xd8] sm:$0xff] %v1611_v24 }
 0x105   :  { %v1070_v7 = vadd.f32 %v1069_v61, %v1007_v57 }
 0x109   :  { %v1642_v1 = vpop.f32.mrf.mxu2 }
 0x10a   :  { %v538_v27 = vpop.f32.mrf.mxu0  ;;  %v1620_v28 = vpop.f32.mrf.mxu1  ;;  %906 = vst [vmem:[#allocation8 + $0x158] sm:$0xff] %v1642_v1 }
 0x10b   :  { %875 = vst [vmem:[#allocation8 + $0x60] sm:$0xff] %v538_v27  ;;  %v1008_v0 = vmul.f32 %v538_v27, %v538_v27  ;;  %v938_v11 = vadd.f32 %v937_v63, %v538_v27  ;;  %v1653_v27 = vpop.f32.mrf.mxu3 }
 0x10c   :  { %891 = vst [vmem:[#allocation8 + $0xe0] sm:$0xff] %v1620_v28 }
 0x10d   :  { %v1071_v19 = vadd.f32 %v1070_v7, %v1008_v0  ;;  %919 = vst [vmem:[#allocation8 + $0x1c0] sm:$0xff] %v1653_v27 }
 0x111   :  { %v1651_v43 = vpop.f32.mrf.mxu2 }
 0x112   :  { %v540_v38 = vpop.f32.mrf.mxu0  ;;  %v1631_v39 = vpop.f32.mrf.mxu1  ;;  %907 = vst [vmem:[#allocation8 + $0x160] sm:$0xff] %v1651_v43 }
 0x113   :  { %876 = vst [vmem:[#allocation8 + $0x68] sm:$0xff] %v540_v38  ;;  %v1009_v15 = vmul.f32 %v540_v38, %v540_v38  ;;  %v939_v31 = vadd.f32 %v938_v11, %v540_v38  ;;  %v1672_v63 = vpop.f32.mrf.mxu3 }
 0x114   :  { %892 = vst [vmem:[#allocation8 + $0xe8] sm:$0xff] %v1631_v39 }
 0x115   :  { %v1072_v33 = vadd.f32 %v1071_v19, %v1009_v15  ;;  %920 = vst [vmem:[#allocation8 + $0x1c8] sm:$0xff] %v1672_v63  ;;  %v1018_v15 = vmul.f32 %v1569_v5, %v1569_v5 }
 0x119   :  { %v1670_v61 = vpop.f32.mrf.mxu2 }
 0x11a   :  { %v543_v58 = vpop.f32.mrf.mxu0  ;;  %v1640_v60 = vpop.f32.mrf.mxu1  ;;  %908 = vst [vmem:[#allocation8 + $0x168] sm:$0xff] %v1670_v61 }
 0x11b   :  { %877 = vst [vmem:[#allocation8 + $0x70] sm:$0xff] %v543_v58  ;;  %v1010_v32 = vmul.f32 %v543_v58, %v543_v58  ;;  %v940_v23 = vadd.f32 %v939_v31, %v543_v58 }
 0x11c   :  { %893 = vst [vmem:[#allocation8 + $0xf0] sm:$0xff] %v1640_v60 }
 0x11d   :  { %v1073_v36 = vadd.f32 %v1072_v33, %v1010_v32  ;;  %v1019_v32 = vmul.f32 %v1575_v8, %v1575_v8 }
 0x122   :  { %v545_v34 = vpop.f32.mrf.mxu0  ;;  %v1649_v35 = vpop.f32.mrf.mxu1 }
 0x123   :  { %878 = vst [vmem:[#allocation8 + $0x78] sm:$0xff] %v545_v34  ;;  %v941_v40 = vadd.f32 %v940_v23, %v545_v34  ;;  %v1011_v42 = vmul.f32 %v545_v34, %v545_v34  ;;  %v1688_v23 = vpop.f32.mrf.mxu2  ;;  %v1690_v34 = vpop.f32.mrf.mxu3 }
 0x124   :  { %894 = vst [vmem:[#allocation8 + $0xf8] sm:$0xff] %v1649_v35 }
 0x125   :  { %v942_v38 = vadd.f32 %v941_v40, %v1538_v37  ;;  %v1074_v48 = vadd.f32 %v1073_v36, %v1011_v42  ;;  %v1015_v37 = vmul.f32 %v1547_v53, %v1547_v53  ;;  %909 = vst [vmem:[#allocation8 + $0x170] sm:$0xff] %v1688_v23 }
 0x126   :  { %921 = vst [vmem:[#allocation8 + $0x1d0] sm:$0xff] %v1690_v34 }
 0x127   :  { %v943_v50 = vadd.f32 %v942_v38, %v1541_v41  ;;  %v1075_v51 = vadd.f32 %v1074_v48, %v1012_v46  ;;  %v1016_v41 = vmul.f32 %v1553_v59, %v1553_v59  ;;  %v1022_v46 = vmul.f32 %v1602_v20, %v1602_v20 }
 0x129   :  { %v944_v54 = vadd.f32 %v943_v50, %v1544_v47  ;;  %v1076_v55 = vadd.f32 %v1075_v51, %v1013_v49  ;;  %v1017_v47 = vmul.f32 %v1563_v2, %v1563_v2  ;;  %v1023_v49 = vmul.f32 %v1611_v24, %v1611_v24 }
 0x12b   :  { %v945_v57 = vadd.f32 %v944_v54, %v1547_v53  ;;  %v1077_v58 = vadd.f32 %v1076_v55, %v1014_v52  ;;  %v1706_v51 = vpop.f32.mrf.mxu2  ;;  %v1708_v52 = vpop.f32.mrf.mxu3  ;;  %v1024_v54 = vmul.f32 %v1620_v28, %v1620_v28 }
 0x12c   :  { %910 = vst [vmem:[#allocation8 + $0x178] sm:$0xff] %v1706_v51 }
 0x12d   :  { %v946_v0 = vadd.f32 %v945_v57, %v1553_v59  ;;  %v1078_v7 = vadd.f32 %v1077_v58, %v1015_v37  ;;  %922 = vst [vmem:[#allocation8 + $0x1d8] sm:$0xff] %v1708_v52 }
 0x12f   :  { %v947_v53 = vadd.f32 %v946_v0, %v1563_v2  ;;  %v1079_v11 = vadd.f32 %v1078_v7, %v1016_v41  ;;  %v1020_v2 = vmul.f32 %v1584_v12, %v1584_v12  ;;  %v1026_v41 = vmul.f32 %v1640_v60, %v1640_v60 }
 0x131   :  { %v1080_v19 = vadd.f32 %v1079_v11, %v1017_v47  ;;  %v948_v31 = vadd.f32 %v947_v53, %v1569_v5  ;;  %v1021_v5 = vmul.f32 %v1593_v16, %v1593_v16  ;;  %v1028_v53 = vmul.f32 %v1549_v56, %v1549_v56 }
 0x133   :  { %v949_v59 = vadd.f32 %v948_v31, %v1575_v8  ;;  %v1081_v33 = vadd.f32 %v1080_v19, %v1018_v15  ;;  %v1724_v47 = vpop.f32.mrf.mxu3  ;;  %v1029_v15 = vmul.f32 %v1557_v62, %v1557_v62  ;;  %v1030_v31 = vmul.f32 %v1565_v3, %v1565_v3 }
 0x134   :  { %923 = vst [vmem:[#allocation8 + $0x1e0] sm:$0xff] %v1724_v47 }
 0x135   :  { %v950_v36 = vadd.f32 %v949_v59, %v1584_v12  ;;  %v1082_v40 = vadd.f32 %v1081_v33, %v1019_v32  ;;  %v1031_v59 = vmul.f32 %v1571_v6, %v1571_v6 }
 0x137   :  { %v951_v8 = vadd.f32 %v950_v36, %v1593_v16  ;;  %v1083_v42 = vadd.f32 %v1082_v40, %v1020_v2 }
 0x139   :  { %v952_v38 = vadd.f32 %v951_v8, %v1602_v20  ;;  %v1084_v48 = vadd.f32 %v1083_v42, %v1021_v5 }
 0x13b   :  { %v953_v12 = vadd.f32 %v952_v38, %v1611_v24  ;;  %v1085_v50 = vadd.f32 %v1084_v48, %v1022_v46  ;;  %v1025_v24 = vmul.f32 %v1631_v39, %v1631_v39  ;;  %v1035_v38 = vmul.f32 %v1604_v21, %v1604_v21 }
 0x13d   :  { %v954_v16 = vadd.f32 %v953_v12, %v1620_v28  ;;  %v1086_v55 = vadd.f32 %v1085_v50, %v1023_v49  ;;  %v1027_v28 = vmul.f32 %v1649_v35, %v1649_v35 }
 0x13f   :  { %v1087_v20 = vadd.f32 %v1086_v55, %v1024_v54  ;;  %v955_v37 = vadd.f32 %v954_v16, %v1631_v39  ;;  %v1038_v54 = vmul.f32 %v1633_v44, %v1633_v44 }
 0x141   :  { %v1088_v57 = vadd.f32 %v1087_v20, %v1025_v24  ;;  %v956_v58 = vadd.f32 %v955_v37, %v1640_v60  ;;  %v1039_v37 = vmul.f32 %v1642_v1, %v1642_v1 }
 0x143   :  { %v1089_v0 = vadd.f32 %v1088_v57, %v1026_v41  ;;  %v957_v7 = vadd.f32 %v956_v58, %v1649_v35  ;;  %v1040_v41 = vmul.f32 %v1651_v43, %v1651_v43 }
 0x145   :  { %v958_v39 = vadd.f32 %v957_v7, %v1549_v56  ;;  %v1090_v11 = vadd.f32 %v1089_v0, %v1027_v28  ;;  %v1739_v56 = vpop.f32.mrf.mxu3 }
 0x146   :  { %924 = vst [vmem:[#allocation8 + $0x1e8] sm:$0xff] %v1739_v56 }
 0x147   :  { %v959_v60 = vadd.f32 %v958_v39, %v1557_v62  ;;  %v1091_v19 = vadd.f32 %v1090_v11, %v1028_v53  ;;  %v1032_v62 = vmul.f32 %v1577_v9, %v1577_v9  ;;  %v1042_v53 = vmul.f32 %v1688_v23, %v1688_v23 }
 0x149   :  { %v960_v35 = vadd.f32 %v959_v60, %v1565_v3  ;;  %v1092_v32 = vadd.f32 %v1091_v19, %v1029_v15  ;;  %v1033_v3 = vmul.f32 %v1586_v13, %v1586_v13  ;;  %v1044_v15 = vmul.f32 %v1579_v10, %v1579_v10 }
 0x14b   :  { %v961_v33 = vadd.f32 %v960_v35, %v1571_v6  ;;  %v1093_v2 = vadd.f32 %v1092_v32, %v1030_v31  ;;  %v1034_v6 = vmul.f32 %v1595_v17, %v1595_v17 }
 0x14d   :  { %v962_v36 = vadd.f32 %v961_v33, %v1577_v9  ;;  %v1094_v40 = vadd.f32 %v1093_v2, %v1031_v59  ;;  %v1754_v9 = vpop.f32.mrf.mxu3 }
 0x14e   :  { %925 = vst [vmem:[#allocation8 + $0x1f0] sm:$0xff] %v1754_v9 }
 0x14f   :  { %v963_v5 = vadd.f32 %v962_v36, %v1586_v13  ;;  %v1095_v8 = vadd.f32 %v1094_v40, %v1032_v62  ;;  %v1036_v13 = vmul.f32 %v1613_v25, %v1613_v25 }
 0x151   :  { %v1096_v42 = vadd.f32 %v1095_v8, %v1033_v3  ;;  %v964_v46 = vadd.f32 %v963_v5, %v1595_v17  ;;  %v1037_v17 = vmul.f32 %v1622_v29, %v1622_v29 }
 0x153   :  { %v965_v48 = vadd.f32 %v964_v46, %v1604_v21  ;;  %v1097_v49 = vadd.f32 %v1096_v42, %v1034_v6 }
 0x155   :  { %v966_v12 = vadd.f32 %v965_v48, %v1613_v25  ;;  %v1098_v50 = vadd.f32 %v1097_v49, %v1035_v38  ;;  %v1772_v57 = vpop.f32.mrf.mxu3 }
 0x156   :  { %926 = vst [vmem:[#allocation8 + $0x1f8] sm:$0xff] %v1772_v57 }
 0x157   :  { %v967_v21 = vadd.f32 %v966_v12, %v1622_v29  ;;  %v1099_v16 = vadd.f32 %v1098_v50, %v1036_v13  ;;  %1144 = dma.vmem_to_hbm [thread:$0]  %s1137_s1, 8192, %s1139_s26, [#allocation5], %s1509_s2, %s1509_s2, %s1510_s27   ;;  %v1055_v50 = vmul.f32 %v1708_v52, %v1708_v52 }
 0x159   :  { %v968_v55 = vadd.f32 %v967_v21, %v1633_v44  ;;  %v1100_v20 = vadd.f32 %v1099_v16, %v1037_v17  ;;  %v1056_v16 = vmul.f32 %v1724_v47, %v1724_v47 }
 0x15b   :  { %v969_v25 = vadd.f32 %v968_v55, %v1642_v1  ;;  %v1101_v24 = vadd.f32 %v1100_v20, %v1038_v54  ;;  %v1041_v1 = vmul.f32 %v1670_v61, %v1670_v61  ;;  %v1057_v55 = vmul.f32 %v1739_v56, %v1739_v56 }
 0x15d   :  { %v1102_v29 = vadd.f32 %v1101_v24, %v1039_v37  ;;  %v970_v58 = vadd.f32 %v969_v25, %v1651_v43  ;;  %v1043_v43 = vmul.f32 %v1706_v51, %v1706_v51  ;;  %v1058_v25 = vmul.f32 %v1754_v9, %v1754_v9 }
 0x15e   :  { %v1059_v24 = vmul.f32 %v1772_v57, %v1772_v57 }
 0x15f   :  { %v1103_v44 = vadd.f32 %v1102_v29, %v1040_v41  ;;  %v971_v0 = vadd.f32 %v970_v58, %v1670_v61  ;;  %v1045_v61 = vmul.f32 %v1588_v14, %v1588_v14 }
 0x161   :  { %v1104_v7 = vadd.f32 %v1103_v44, %v1041_v1  ;;  %v972_v28 = vadd.f32 %v971_v0, %v1688_v23  ;;  %v1046_v23 = vmul.f32 %v1597_v18, %v1597_v18 }
 0x163   :  { %v1105_v39 = vadd.f32 %v1104_v7, %v1042_v53  ;;  %v973_v11 = vadd.f32 %v972_v28, %v1706_v51  ;;  %v1047_v51 = vmul.f32 %v1606_v22, %v1606_v22 }
 0x165   :  { %v974_v60 = vadd.f32 %v973_v11, %v1579_v10  ;;  %v1106_v19 = vadd.f32 %v1105_v39, %v1043_v43  ;;  %v1048_v10 = vmul.f32 %v1615_v26, %v1615_v26 }
 0x167   :  { %v975_v31 = vadd.f32 %v974_v60, %v1588_v14  ;;  %v1107_v35 = vadd.f32 %v1106_v19, %v1044_v15  ;;  %v1049_v14 = vmul.f32 %v1624_v30, %v1624_v30 }
 0x169   :  { %v976_v32 = vadd.f32 %v975_v31, %v1597_v18  ;;  %v1108_v59 = vadd.f32 %v1107_v35, %v1045_v61  ;;  %v1050_v18 = vmul.f32 %v1635_v45, %v1635_v45 }
 0x16b   :  { %v977_v33 = vadd.f32 %v976_v32, %v1606_v22  ;;  %v1109_v2 = vadd.f32 %v1108_v59, %v1046_v23  ;;  %v1051_v22 = vmul.f32 %v1644_v4, %v1644_v4 }
 0x16d   :  { %v978_v62 = vadd.f32 %v977_v33, %v1615_v26  ;;  %v1110_v36 = vadd.f32 %v1109_v2, %v1047_v51  ;;  %v1052_v26 = vmul.f32 %v1653_v27, %v1653_v27 }
 0x16f   :  { %v979_v40 = vadd.f32 %v978_v62, %v1624_v30  ;;  %v1111_v3 = vadd.f32 %v1110_v36, %v1048_v10  ;;  %v1053_v30 = vmul.f32 %v1672_v63, %v1672_v63 }
 0x171   :  { %v1112_v5 = vadd.f32 %v1111_v3, %v1049_v14  ;;  %v980_v8 = vadd.f32 %v979_v40, %v1635_v45  ;;  %v1054_v45 = vmul.f32 %v1690_v34, %v1690_v34 }
 0x173   :  { %v981_v6 = vadd.f32 %v980_v8, %v1644_v4  ;;  %v1113_v42 = vadd.f32 %v1112_v5, %v1050_v18 }
 0x175   :  { %v982_v46 = vadd.f32 %v981_v6, %v1653_v27  ;;  %v1114_v38 = vadd.f32 %v1113_v42, %v1051_v22 }
 0x177   :  { %v983_v48 = vadd.f32 %v982_v46, %v1672_v63  ;;  %v1115_v49 = vadd.f32 %v1114_v38, %v1052_v26 }
 0x179   :  { %v984_v13 = vadd.f32 %v983_v48, %v1690_v34  ;;  %v1116_v12 = vadd.f32 %v1115_v49, %v1053_v30 }
 0x17b   :  { %v985_v4 = vadd.f32 %v984_v13, %v1708_v52  ;;  %v1117_v17 = vadd.f32 %v1116_v12, %v1054_v45 }
 0x17d   :  { %v1118_v27 = vadd.f32 %v1117_v17, %v1055_v50  ;;  %v986_v21 = vadd.f32 %v985_v4, %v1724_v47 }
 0x17f   :  { %v1119_v63 = vadd.f32 %v1118_v27, %v1056_v16  ;;  %v987_v54 = vadd.f32 %v986_v21, %v1739_v56 }
 0x181   :  { %v1120_v34 = vadd.f32 %v1119_v63, %v1057_v55  ;;  %v988_v20 = vadd.f32 %v987_v54, %v1754_v9 }
 0x183   :  { %v1121_v52 = vadd.f32 %v1120_v34, %v1058_v25  ;;  %v989_v37 = vadd.f32 %v988_v20, %v1772_v57 }
 0x185   :  { %v990_v29 = vrot.slane %v989_v37, 4  ;;  %v1122_v47 = vadd.f32 %v1121_v52, %v1059_v24 }
 0x187   :  { %v991_v58 = vadd.f32 %v990_v29, %v989_v37  ;;  %v1123_v41 = vrot.slane %v1122_v47, 4 }
 0x189   :  { %v992_v44 = vrot.slane %v991_v58, 2  ;;  %v1124_v0 = vadd.f32 %v1123_v41, %v1122_v47 }
 0x18b   :  { %v993_v1 = vadd.f32 %v992_v44, %v991_v58  ;;  %v1125_v56 = vrot.slane %v1124_v0, 2 }
 0x18d   :  { %v994_v7 = vrot.slane %v993_v1, 1  ;;  %v1126_v28 = vadd.f32 %v1125_v56, %v1124_v0 }
 0x18f   :  { %v1127_v53 = vrot.slane %v1126_v28, 1  ;;  %v995_v9 = vadd.f32 %v994_v7, %v993_v1 }
 0x191   :  { %v1128_v57 = vadd.f32 %v1127_v53, %v1126_v28 }
 0x193   :  { %v1130_v39 = vsel %vm1129_vm0, %v995_v9, %v1128_v57 }
 0x194   :  { %1131 = vst [vmem:[#allocation9] sm:$0x3] %v1130_v39 }
 0x195   :  { %1155 = dma.vmem_to_hbm [thread:$0]  %s1151_s29, 32, %s1153_s5, [#allocation10]  }
 0x196   :  { %1500 = dma.done.wait [#allocation5], 8192  }
 0x197   :  { %1501 = vsyncadd [#allocation5], 4294959104 }
 0x198   :  { %1502 = dma.done.wait [#allocation10], 32  }
 0x199   :  { %1503 = vsyncadd [#allocation10], 4294967264 }
 0x19a   :  { %1164 = vsyncpa [#allocation4], 1 }
 0x19b   :  { %1165 = vsyncpa [#allocation7], 1 }
 0x19c   :  { %1166 = vsyncpa [#allocation5], 1 }
 0x19d   :  { %1167 = vsyncpa [#allocation10], 1 }

</bundles_post_ra>
